<compile_context>
chip_gen: v6e
topology: v6e:2x2x1
jax: 0.10.0
libtpu: 0.0.40
codegen_flags: <defaults>
</compile_context>

<pallas_src>
import functools

import jax
import jax.numpy as jnp
from jax.experimental import pallas as pl
from jax.experimental.pallas import tpu as pltpu

LANES = 128
TARGET_TILE_BYTES = 4 * 1024 * 1024   # ~4 MiB per input per grid step
MAX_ACC_ROWS = 64                      # wide accumulator -> ILP across vregs
VMEM_LIMIT_BYTES = 48 * 1024 * 1024    # < 64 MiB (v7x physical), << 128 MiB (v5e/v6e)


def _num_core_splits() -> int:
    """2-way grid split only on chips with 2 TensorCores per chip (v7x)."""
    try:
        kind = jax.devices()[0].device_kind.lower()
    except Exception:
        return 1
    return 2 if ("v7" in kind or "7x" in kind) else 1


def _mse_partial_kernel(p_ref, t_ref, o_ref, acc_ref, *,
                        rows, inner, tile_rows, acc_rows, mask_start, any_mask):
    """Accumulate per-lane/sublane partial sums of (t - p)^2 into acc_ref."""
    c = pl.program_id(0)   # core-split axis ("parallel")
    k = pl.program_id(1)   # reduction axis  ("arbitrary")

    @pl.when(k == 0)
    def _():
        acc_ref[...] = jnp.zeros_like(acc_ref)

    def fold(sq):
        # (tile_rows, 128) -> (tile_rows//acc_rows, acc_rows, 128), sum slabs.
        # Pure VPU adds; acc_rows/8 independent vreg chains.
        return jnp.sum(sq.reshape(tile_rows // acc_rows, acc_rows, LANES), axis=0)

    def accumulate_unmasked():
        d = t_ref[...].astype(jnp.float32) - p_ref[...].astype(jnp.float32)
        acc_ref[...] += fold(d * d)

    if not any_mask:
        # Statically known: every block is fully valid -> no mask anywhere.
        accumulate_unmasked()
    else:
        blk = c * inner + k

        @pl.when(blk < mask_start)
        def _():
            accumulate_unmasked()

        @pl.when(blk >= mask_start)
        def _():
            # Edge block (partial last block) or clamped out-of-range block.
            row_start = blk * tile_rows
            row_ids = row_start + jax.lax.broadcasted_iota(
                jnp.int32, (tile_rows, LANES), 0)
            valid = row_ids < rows
            d = t_ref[...].astype(jnp.float32) - p_ref[...].astype(jnp.float32)
            acc_ref[...] += fold(jnp.where(valid, d * d, 0.0))

    @pl.when(k == pl.num_programs(1) - 1)
    def _():
        o_ref[...] = acc_ref[...]


def _mse_partial_sums(p2, t2, rows, tile_rows, acc_rows, splits):
    """Run the kernel over the aligned (rows, 128) slab; return wide partials."""
    nb = pl.cdiv(rows, tile_rows)
    inner = pl.cdiv(nb, splits)

    last_partial = (rows % tile_rows) != 0
    has_clamped = (inner * splits) != nb
    any_mask = last_partial or has_clamped
    mask_start = (nb - 1) if last_partial else nb

    def in_map(c, k):
        # Clamp fully out-of-range blocks onto the last valid block; the
        # in-kernel row mask zeroes their contribution.
        return (jnp.minimum(c * inner + k, nb - 1), 0)

    kernel = functools.partial(
        _mse_partial_kernel, rows=rows, inner=inner, tile_rows=tile_rows,
        acc_rows=acc_rows, mask_start=mask_start, any_mask=any_mask)

    return pl.pallas_call(
        kernel,
        out_shape=jax.ShapeDtypeStruct((splits * acc_rows, LANES), jnp.float32),
        grid_spec=pltpu.PrefetchScalarGridSpec(
            num_scalar_prefetch=0,
            grid=(splits, inner),
            in_specs=[
                pl.BlockSpec((tile_rows, LANES), in_map),
                pl.BlockSpec((tile_rows, LANES), in_map),
            ],
            out_specs=pl.BlockSpec((acc_rows, LANES), lambda c, k: (c, 0)),
            scratch_shapes=[pltpu.VMEM((acc_rows, LANES), jnp.float32)],
        ),
        compiler_params=pltpu.CompilerParams(
            dimension_semantics=("parallel", "arbitrary"),
            vmem_limit_bytes=VMEM_LIMIT_BYTES,
        ),
    )(p2, t2)


def mse_loss(y_pred: jax.Array, y_true: jax.Array) -> jax.Array:
    """Mean squared error: mean((y_true - y_pred)**2), computed in f32."""
    assert y_pred.shape == y_true.shape, "shapes must match (no broadcasting here)"
    n_elems = y_pred.size
    if n_elems == 0:
        # torch.mean of an empty tensor is NaN.
        return jnp.float32(float("nan"))

    # Stream natively for 1/2/4-byte matching dtypes; otherwise fall back to
    # an f32 cast (matches torch's .float() semantics either way).
    if y_pred.dtype != y_true.dtype or y_pred.dtype.itemsize not in (1, 2, 4):
        y_pred = y_pred.astype(jnp.float32)
        y_true = y_true.astype(jnp.float32)

    p = jnp.ravel(y_pred)
    t = jnp.ravel(y_true)

    itemsize = p.dtype.itemsize
    pack = 32 // itemsize              # sublane packing: 8 f32, 16 bf16, 32 int8
    align = pack * LANES
    n_main = (n_elems // align) * align

    total = jnp.float32(0.0)

    if n_main > 0:
        rows = n_main // LANES         # multiple of `pack`
        p2 = p[:n_main].reshape(rows, LANES)
        t2 = t[:n_main].reshape(rows, LANES)

        # Dtype-aware tile: ~4 MiB of input per grid step.
        max_tile_rows = TARGET_TILE_BYTES // (LANES * itemsize)
        tile_rows = min(max_tile_rows, rows)

        acc_rows = MAX_ACC_ROWS
        while tile_rows % acc_rows != 0:
            acc_rows //= 2

        nb = pl.cdiv(rows, tile_rows)
        splits = _num_core_splits()
        if nb < splits:
            splits = 1                 # never re-read whole input for a masked pass

        partials = _mse_partial_sums(p2, t2, rows, tile_rows, acc_rows, splits)
        # Single cross-lane collapse, once, outside the grid loop.
        total = total + jnp.sum(partials)

    if n_main < n_elems:
        # Tiny ragged tail (< pack*128 elements): plain JAX, no full-array pad.
        tp = p[n_main:].astype(jnp.float32)
        tt = t[n_main:].astype(jnp.float32)
        total = total + jnp.sum((tt - tp) ** 2)

    return total / jnp.float32(n_elems)


if __name__ == "__main__":
    key = jax.random.PRNGKey(0)
    k1, k2, k3, k4, k5, k6 = jax.random.split(key, 6)

    # Primary small NCHW-like regression output.
    y_pred = jax.random.normal(k1, (2, 4, 16, 16), dtype=jnp.float32)
    y_true = jax.random.normal(k2, (2, 4, 16, 16), dtype=jnp.float32)
    loss = mse_loss(y_pred, y_true)
    jax.block_until_ready(loss)
    ref = jnp.mean((y_true - y_pred) ** 2)
    assert jnp.allclose(loss, ref, rtol=1e-5, atol=1e-6), (loss, ref)

    # Unaligned size: kernel streams the aligned prefix, plain-JAX ragged tail.
    yp2 = jax.random.normal(k3, (9, 130), dtype=jnp.float32)
    yt2 = jax.random.normal(k4, (9, 130), dtype=jnp.float32)
    l2 = mse_loss(yp2, yt2)
    r2 = jnp.mean((yt2 - yp2) ** 2)
    assert jnp.allclose(l2, r2, rtol=1e-5, atol=1e-6), (l2, r2)

    # bf16 inputs: native-dtype streaming with in-kernel upcast to f32.
    yp3 = jax.random.normal(k5, (4, 8, 64), dtype=jnp.bfloat16)
    yt3 = jax.random.normal(k6, (4, 8, 64), dtype=jnp.bfloat16)
    l3 = mse_loss(yp3, yt3)
    r3 = jnp.mean((yt3.astype(jnp.float32) - yp3.astype(jnp.float32)) ** 2)
    assert jnp.allclose(l3, r3, rtol=1e-5, atol=1e-6), (l3, r3)

    jax.block_until_ready((l2, l3))
    print("KERNEL_OK")
</pallas_src>

<mosaic_0001>
module attributes {stable_mosaic.version = 11 : i64} {
  func.func @_mse_partial_kernel(%arg0: i32, %arg1: i32, %arg2: memref<16x128xf32, #tpu.memory_space<vmem>>, %arg3: memref<16x128xf32, #tpu.memory_space<vmem>>, %arg4: memref<16x128xf32, #tpu.memory_space<vmem>>, %arg5: memref<16x128xf32, #tpu.memory_space<vmem>>) attributes {dimension_semantics = [#tpu.dimension_semantics<parallel>, #tpu.dimension_semantics<arbitrary>], iteration_bounds = array<i64: 1, 1>, scalar_prefetch = 0 : i64, scratch_operands = 1 : i64, tpu.core_type = #tpu.core_type<tc>, window_params = [{transform_indices = @transform_0, window_bounds = array<i64: 16, 128>}, {transform_indices = @transform_1, window_bounds = array<i64: 16, 128>}, {transform_indices = @transform_2, window_bounds = array<i64: 16, 128>}]} {
    %c0_i32 = arith.constant 0 : i32
    %0 = arith.cmpi eq, %arg1, %c0_i32 : i32
    %1 = arith.extui %0 : i1 to i32
    %c0_i32_0 = arith.constant 0 : i32
    %2 = arith.cmpi ne, %1, %c0_i32_0 : i32
    scf.if %2 {
      %cst_10 = arith.constant 0.000000e+00 : f32
      %15 = vector.broadcast %cst_10 : f32 to vector<16x128xf32>
      %c0_11 = arith.constant 0 : index
      %c0_12 = arith.constant 0 : index
      %16 = vector.load %arg5[%c0_11, %c0_12] : memref<16x128xf32, #tpu.memory_space<vmem>>, vector<16x128xf32>
      tpu.vector_store %arg5[%c0_11, %c0_12], %15 {strides = array<i32>} : memref<16x128xf32, #tpu.memory_space<vmem>>, vector<16x128xf32>,
    } else {
    }
    %c0 = arith.constant 0 : index
    %c0_1 = arith.constant 0 : index
    %3 = vector.load %arg3[%c0, %c0_1] : memref<16x128xf32, #tpu.memory_space<vmem>>, vector<16x128xf32>
    %c0_2 = arith.constant 0 : index
    %c0_3 = arith.constant 0 : index
    %4 = vector.load %arg2[%c0_2, %c0_3] : memref<16x128xf32, #tpu.memory_space<vmem>>, vector<16x128xf32>
    %5 = arith.subf %3, %4 : vector<16x128xf32>
    %c0_4 = arith.constant 0 : index
    %c0_5 = arith.constant 0 : index
    %6 = vector.load %arg5[%c0_4, %c0_5] : memref<16x128xf32, #tpu.memory_space<vmem>>, vector<16x128xf32>
    %7 = arith.mulf %5, %5 : vector<16x128xf32>
    %8 = vector.shape_cast %7 : vector<16x128xf32> to vector<1x16x128xf32>
    %cst = arith.constant dense<0.000000e+00> : vector<16x128xf32>
    %9 = vector.multi_reduction <add>, %8, %cst [0] : vector<1x16x128xf32> to vector<16x128xf32>
    %10 = arith.addf %6, %9 : vector<16x128xf32>
    %c0_6 = arith.constant 0 : index
    %c0_7 = arith.constant 0 : index
    %11 = vector.load %arg5[%c0_6, %c0_7] : memref<16x128xf32, #tpu.memory_space<vmem>>, vector<16x128xf32>
    tpu.vector_store %arg5[%c0_6, %c0_7], %10 {strides = array<i32>} : memref<16x128xf32, #tpu.memory_space<vmem>>, vector<16x128xf32>,
    %c0_i32_8 = arith.constant 0 : i32
    %12 = arith.cmpi eq, %arg1, %c0_i32_8 : i32
    %13 = arith.extui %12 : i1 to i32
    %c0_i32_9 = arith.constant 0 : i32
    %14 = arith.cmpi ne, %13, %c0_i32_9 : i32
    scf.if %14 {
      %c0_10 = arith.constant 0 : index
      %c0_11 = arith.constant 0 : index
      %15 = vector.load %arg5[%c0_10, %c0_11] : memref<16x128xf32, #tpu.memory_space<vmem>>, vector<16x128xf32>
      %c0_12 = arith.constant 0 : index
      %c0_13 = arith.constant 0 : index
      %16 = vector.load %arg4[%c0_12, %c0_13] : memref<16x128xf32, #tpu.memory_space<vmem>>, vector<16x128xf32>
      tpu.vector_store %arg4[%c0_12, %c0_13], %15 {strides = array<i32>} : memref<16x128xf32, #tpu.memory_space<vmem>>, vector<16x128xf32>,
    } else {
    }
    return
  }
  func.func @transform_0(%arg0: i32, %arg1: i32) -> (i32, i32) {
    %c1_i32 = arith.constant 1 : i32
    %0 = arith.muli %arg0, %c1_i32 : i32
    %1 = arith.addi %0, %arg1 : i32
    %c0_i32 = arith.constant 0 : i32
    %2 = arith.minsi %1, %c0_i32 : i32
    %c0_i32_0 = arith.constant 0 : i32
    %c0_i32_1 = arith.constant 0 : i32
    return %2, %c0_i32_0 : i32, i32
  }
  func.func @transform_1(%arg0: i32, %arg1: i32) -> (i32, i32) {
    %c1_i32 = arith.constant 1 : i32
    %0 = arith.muli %arg0, %c1_i32 : i32
    %1 = arith.addi %0, %arg1 : i32
    %c0_i32 = arith.constant 0 : i32
    %2 = arith.minsi %1, %c0_i32 : i32
    %c0_i32_0 = arith.constant 0 : i32
    %c0_i32_1 = arith.constant 0 : i32
    return %2, %c0_i32_0 : i32, i32
  }
  func.func @transform_2(%arg0: i32, %arg1: i32) -> (i32, i32) {
    %c0_i32 = arith.constant 0 : i32
    %c0_i32_0 = arith.constant 0 : i32
    return %arg0, %c0_i32 : i32, i32
  }
}

</mosaic_0001>

<bundles_post_ra>
// kernel: tpu_custom_call.1
= control target key start
LH: loop header
LB: loop body
LE: loop exit
PB: predicated region body
PF: predicated region fallthrough
CT: control target
= control target key end

     0   :  { %7 = vsyncpa [#allocation4], 0  ;;  %s220_s0 = inlined_call_operand.hbm [shape: f32[16,128], index: 0, kind: input, shape index: {}]   ;;  %s221_s1 = inlined_call_operand.hbm [shape: f32[16,128], index: 1, kind: input, shape index: {}]   ;;  %s222_s2 = inlined_call_operand.hbm [shape: f32[16,128], index: 2, kind: output, shape index: {}]  }
   0x1   :  { %8 = vsyncpa [#allocation7], 0 }
   0x2   :  { %9 = vsyncpa [#allocation5], 0  ;;  %s182_s9 = smov [#allocation3]  }
   0x3   :  { %s21_s10 = sshll.u32 %s182_s9, 4  ;;  %s22_s10 = int_to_ptr.vmem [resolvable:$true] %s21_s10 }
   0x4   :  { %s124_s11 = scalar_lea.vmem %s22_s10, 256  ;;  %p129_p1 = scmp.lt.s32.totalorder %s22_s10, %s22_s10 }
   0x5   :  { %p125_p0 = scmp.ne.s32.totalorder %s22_s10, %s124_s11  ;;  %p130_p2 = scmp.lt.s32.totalorder %s124_s11, %s124_s11 }
   0x7   :  { %p131_p3 = por %p130_p2, %p129_p1 }
   0x9   :  { %p132_p4 = pnand %p131_p3, %p125_p0 }
   0xb   :  { %135 = shalt.err (!%p132_p4)
}
   0xc   :  { %s183_s12 = smov 128   ;;  %s184_s13 = smov 8  }
   0xd   :  { %27 = dma.hbm_to_vmem [thread:$0]  %s220_s0, 256, %s22_s10, [#allocation4], %s183_s12, %s183_s12, %s184_s13  }
   0xe   :  { %s185_s16 = smov [#allocation6]  }
   0xf   :  { %s39_s17 = sshll.u32 %s185_s16, 4  ;;  %s40_s17 = int_to_ptr.vmem [resolvable:$true] %s39_s17 }
  0x10   :  { %s144_s18 = scalar_lea.vmem %s40_s17, 256  ;;  %p149_p6 = scmp.lt.s32.totalorder %s40_s17, %s40_s17 }
  0x11   :  { %p145_p5 = scmp.ne.s32.totalorder %s40_s17, %s144_s18  ;;  %p150_p7 = scmp.lt.s32.totalorder %s144_s18, %s144_s18 }
  0x13   :  { %p151_p8 = por %p150_p7, %p149_p6 }
  0x15   :  { %p152_p9 = pnand %p151_p8, %p145_p5 }
  0x17   :  { %155 = shalt.err (!%p152_p9)
}
  0x18   :  { %45 = dma.hbm_to_vmem [thread:$0]  %s221_s1, 256, %s40_s17, [#allocation7], %s183_s12, %s183_s12, %s184_s13  }
  0x19   :  { %176 = dma.done.wait [#allocation4], 256  }
  0x1a   :  { %177 = vsyncadd [#allocation4], 4294967040 }
  0x1b   :  { %178 = dma.done.wait [#allocation7], 256  }
  0x1c   :  { %179 = vsyncadd [#allocation7], 4294967040  ;;  %v66_v0 = vld [vmem:[#allocation6] sm:$0xff]  ;;  %v68_v1 = vld [vmem:[#allocation3] sm:$0xff]  ;;  %s186_s0 = smov [#allocation8]  }
  0x1d   :  { %v67_v2 = vld [vmem:[#allocation6 + $0x8] sm:$0xff]  ;;  %v70_v3 = vsub.f32 %v66_v0, %v68_v1  ;;  %v69_v4 = vld [vmem:[#allocation3 + $0x8] sm:$0xff]  ;;  %s94_s21 = sshll.u32 %s186_s0, 4  ;;  %s95_s21 = int_to_ptr.vmem [resolvable:$true] %s94_s21 }
  0x1e   :  { %v71_v5 = vsub.f32 %v67_v2, %v69_v4  ;;  %s156_s22 = scalar_lea.vmem %s95_s21, 256  ;;  %p161_p11 = scmp.lt.s32.totalorder %s95_s21, %s95_s21 }
  0x1f   :  { %v74_v6 = vmul.f32 %v70_v3, %v70_v3  ;;  %p157_p10 = scmp.ne.s32.totalorder %s95_s21, %s156_s22  ;;  %p162_p12 = scmp.lt.s32.totalorder %s156_s22, %s156_s22 }
  0x20   :  { %v75_v7 = vmul.f32 %v71_v5, %v71_v5 }
  0x21   :  { %87 = vst [vmem:[#allocation8] sm:$0xff] %v74_v6  ;;  %p163_p13 = por %p162_p12, %p161_p11 }
  0x22   :  { %88 = vst [vmem:[#allocation8 + $0x8] sm:$0xff] %v75_v7 }
  0x23   :  { %p164_p0 = pnand %p163_p13, %p157_p10 }
  0x25   :  { %167 = shalt.err (!%p164_p0)
}
  0x26   :  { %100 = dma.vmem_to_hbm [thread:$0]  %s95_s21, 256, %s222_s2, [#allocation5], %s183_s12, %s183_s12, %s184_s13  }
  0x27   :  { %180 = dma.done.wait [#allocation5], 256  }
  0x28   :  { %181 = vsyncadd [#allocation5], 4294967040 }
  0x29   :  { %104 = vsyncpa [#allocation4], 1 }
  0x2a   :  { %105 = vsyncpa [#allocation7], 1 }
  0x2b   :  { %106 = vsyncpa [#allocation5], 1 }

</bundles_post_ra>
